<compile_context>
chip_gen: v6e
topology: v6e:2x2x1
jax: 0.10.0
libtpu: 0.0.40
codegen_flags: <defaults>
</compile_context>

<pallas_src>
import functools

import jax
import jax.numpy as jnp
import numpy as np
from jax.experimental import pallas as pl
from jax.experimental.pallas import tpu as pltpu

V_TH = 1.0
BN_EPS = 1e-5


def _round_up(a, b):
    return ((a + b - 1) // b) * b


def _vmem_limit_bytes():
    """Physical VMEM minus headroom, capped at 100 MiB (v5e/v6e); ~56 MiB on v7x."""
    try:
        cap = int(pltpu.get_tpu_info().vmem_capacity_bytes)
    except Exception:
        return 48 * 1024 * 1024
    return int(max(32 * 1024 * 1024,
                   min(cap - 8 * 1024 * 1024, 100 * 1024 * 1024)))


def _choose_row_tile(nrows, cap):
    """Largest multiple of 8 that divides nrows and is <= cap (None if impossible)."""
    cap = min(cap, nrows)
    for t in range(cap - cap % 8, 7, -8):
        if nrows % t == 0:
            return t
    return None


# --------------------------- IF neuron kernel --------------------------------
def if_neuron_kernel(x_ref, o_ref, v_ref):
    """Multi-step IF neuron.  Grid = (L_tiles, T); T innermost, membrane in VMEM scratch."""
    t = pl.program_id(1)

    @pl.when(t == 0)
    def _():
        v_ref[...] = jnp.zeros_like(v_ref)

    v = v_ref[...] + x_ref[0]
    spk = (v >= V_TH).astype(jnp.float32)     # forward of the ATan surrogate is Heaviside
    v_ref[...] = v * (1.0 - spk)              # hard reset (v_reset = 0)
    o_ref[0] = spk.astype(o_ref.dtype)        # bf16 spikes (exact 0/1)


# ---------------- fused im2col conv + BN statistics (pass 1) ------------------
def conv_stats_kernel(s_ref, w_ref, y_ref, psum_ref, pssq_ref, *, wo1):
    """Fused im2col + 3x3/s2 conv (bf16 MXU) + per-image BN stat partials.

    s_ref : (1, 4, Sp, C) bf16 space-to-depth padded image;
            s[0, ph*2+pw, ih*wo1+iw, c] == x_pad[2*ih+ph, 2*iw+pw, c]
    w_ref : (9, C, Npad) bf16 tap-major conv weight
    y_ref : (1, M, Npad) bf16 un-normalized conv output, M = Ho*wo1
            (rows with ow == wo1-1 are junk and are sliced off in the wrapper)
    psum_ref / pssq_ref : (1, 1, Npad) f32 per-image partial sums over valid rows
    """
    m, npad = y_ref.shape[1], y_ref.shape[2]

    acc = jnp.zeros((m, npad), jnp.float32)
    for kh in range(3):
        for kw in range(3):
            pidx = (kh % 2) * 2 + (kw % 2)
            off = (kh // 2) * wo1 + (kw // 2)
            tap = s_ref[0, pidx, off:off + m, :]                  # (M, C) bf16, contiguous
            acc = acc + jnp.dot(tap, w_ref[kh * 3 + kw],
                                preferred_element_type=jnp.float32)
    y_ref[0] = acc.astype(y_ref.dtype)

    # mask the junk column (ow == wo1-1) out of the BN statistics
    q = jax.lax.broadcasted_iota(jnp.int32, (m, npad), 0)
    accv = jnp.where((q % wo1) != (wo1 - 1), acc, 0.0)
    psum_ref[0] = jnp.sum(accv, axis=0, keepdims=True)
    pssq_ref[0] = jnp.sum(accv * accv, axis=0, keepdims=True)


# ---------------------- folded-BN affine (pass 2) -----------------------------
def bn_apply_kernel(y_ref, scale_ref, shift_ref, o_ref):
    """Pure elementwise y*scale + shift on the stored conv output (no matmul recompute)."""
    o_ref[...] = (y_ref[...].astype(jnp.float32) * scale_ref[...]
                  + shift_ref[...]).astype(o_ref.dtype)


# --------------------------------- wrapper ------------------------------------
def spk_downsample(x, temb, conv_w, conv_b, bn_gamma, bn_beta):
    """x: (T, B, C, H, W) float32.  temb is unused (matches the PyTorch forward)."""
    del temb
    # conv bias is zero-init and a constant per-channel bias cancels exactly under
    # training-mode BN, so it is never needed.
    del conv_b
    T, B, C, H, W = x.shape
    assert H % 2 == 0 and W % 2 == 0, "UNet downsample expects even spatial dims"
    N = T * B
    Ho, Wo = H // 2, W // 2
    vmem_limit = _vmem_limit_bytes()

    # ---------------- IF neuron: lane-dense tiled elementwise recurrence ------
    L = B * C * H * W
    LR0 = -(-L // 128)
    cap = min(8192, LR0 if LR0 < 16 else max(8, LR0 // 2))   # keep >=2 tiles for megacore
    tile_r = _choose_row_tile(LR0, cap) if L % 128 == 0 else None
    if tile_r is None:                       # odd shapes only: fall back to padding
        tile_r = max(8, min(512, _round_up(LR0, 8)))
        LR = _round_up(LR0, tile_r)
        x3 = jnp.pad(x.reshape(T, L), ((0, 0), (0, LR * 128 - L))).reshape(T, LR, 128)
    else:
        LR = LR0
        x3 = x.reshape(T, LR, 128)
    grid_l = LR // tile_r

    spikes = pl.pallas_call(
        if_neuron_kernel,
        out_shape=jax.ShapeDtypeStruct((T, LR, 128), jnp.bfloat16),
        grid_spec=pltpu.PrefetchScalarGridSpec(
            num_scalar_prefetch=0,
            grid=(grid_l, T),
            in_specs=[pl.BlockSpec((1, tile_r, 128), lambda l, t: (t, l, 0))],
            out_specs=pl.BlockSpec((1, tile_r, 128), lambda l, t: (t, l, 0)),
            scratch_shapes=[pltpu.VMEM((tile_r, 128), jnp.float32)],
        ),
        compiler_params=pltpu.CompilerParams(
            dimension_semantics=("parallel", "arbitrary"),
            vmem_limit_bytes=vmem_limit),
    )(x3)

    spikes = spikes.reshape(T, LR * 128)
    if LR * 128 != L:
        spikes = spikes[:, :L]

    # ------------- stride-2 space-to-depth relayout of the spikes (bf16) ------
    # s2d[n, ph*2+pw, ih*(Wo+1)+iw, c] == spikes_pad[n, 2*ih+ph, 2*iw+pw, c], so every
    # conv tap (kh,kw) is a contiguous row-slice of the flattened spatial dim.
    # TODO(synk): fuse this relayout (and ideally the IF neuron itself) into the conv
    # kernel's input DMA so the spike tensor is written/read only once.
    Ho1, Wo1 = Ho + 1, Wo + 1
    Sflat = Ho1 * Wo1
    Sp = _round_up(Sflat + 1, 8)             # +1: the (kh,kw)=(2,2) tap reads one row past
    s_pad = jnp.pad(spikes.reshape(N, C, H, W), ((0, 0), (0, 0), (1, 1), (1, 1)))
    s2d = jnp.transpose(s_pad.reshape(N, C, Ho1, 2, Wo1, 2), (0, 3, 5, 2, 4, 1))
    s2d = s2d.reshape(N, 4, Sflat, C)
    s2d = jnp.pad(s2d, ((0, 0), (0, 0), (0, Sp - Sflat), (0, 0)))

    M = Ho * Wo1                              # conv-output rows per image (1 junk col / row)
    Npad = _round_up(C, 128)                  # lane-dense MXU columns / output stores

    # PyTorch weight (Cout, Cin, kh, kw) -> (tap, Cin, Cout), pad Cout, bf16 MXU path.
    w_taps = jnp.transpose(conv_w, (2, 3, 1, 0)).reshape(9, C, C)
    w_taps = jnp.pad(w_taps, ((0, 0), (0, 0), (0, Npad - C))).astype(jnp.bfloat16)

    # ------------- pass 1: fused im2col conv + per-image BN stat partials ------
    y, psum, pssq = pl.pallas_call(
        functools.partial(conv_stats_kernel, wo1=Wo1),
        out_shape=(jax.ShapeDtypeStruct((N, M, Npad), jnp.bfloat16),
                   jax.ShapeDtypeStruct((N, 1, Npad), jnp.float32),
                   jax.ShapeDtypeStruct((N, 1, Npad), jnp.float32)),
        grid_spec=pltpu.PrefetchScalarGridSpec(
            num_scalar_prefetch=0,
            grid=(N,),
            in_specs=[pl.BlockSpec((1, 4, Sp, C), lambda n: (n, 0, 0, 0)),
                      pl.BlockSpec((9, C, Npad), lambda n: (0, 0, 0))],
            out_specs=(pl.BlockSpec((1, M, Npad), lambda n: (n, 0, 0)),
                       pl.BlockSpec((1, 1, Npad), lambda n: (n, 0, 0)),
                       pl.BlockSpec((1, 1, Npad), lambda n: (n, 0, 0))),
        ),
        compiler_params=pltpu.CompilerParams(
            dimension_semantics=("parallel",),
            vmem_limit_bytes=vmem_limit),
    )(s2d, w_taps)

    # Fold BN (training mode, biased variance) into per-channel scale/shift (tiny, XLA).
    n_valid = jnp.float32(N * Ho * Wo)
    mean = jnp.sum(psum, axis=0) / n_valid                          # (1, Npad)
    var = jnp.maximum(jnp.sum(pssq, axis=0) / n_valid - mean * mean, 0.0)
    inv = jax.lax.rsqrt(var + BN_EPS)
    gamma_p = jnp.pad(bn_gamma.astype(jnp.float32), (0, Npad - C)).reshape(1, Npad)
    beta_p = jnp.pad(bn_beta.astype(jnp.float32), (0, Npad - C)).reshape(1, Npad)
    scale = (gamma_p * inv).reshape(1, 1, Npad)
    shift = (beta_p - mean * gamma_p * inv).reshape(1, 1, Npad)

    # ------------- pass 2: elementwise folded-BN affine ------------------------
    out = pl.pallas_call(
        bn_apply_kernel,
        out_shape=jax.ShapeDtypeStruct((N, M, Npad), jnp.float32),
        grid_spec=pltpu.PrefetchScalarGridSpec(
            num_scalar_prefetch=0,
            grid=(N,),
            in_specs=[pl.BlockSpec((1, M, Npad), lambda n: (n, 0, 0)),
                      pl.BlockSpec((1, 1, Npad), lambda n: (0, 0, 0)),
                      pl.BlockSpec((1, 1, Npad), lambda n: (0, 0, 0))],
            out_specs=pl.BlockSpec((1, M, Npad), lambda n: (n, 0, 0)),
        ),
        compiler_params=pltpu.CompilerParams(
            dimension_semantics=("parallel",),
            vmem_limit_bytes=vmem_limit),
    )(y, scale, shift)

    # drop the junk column / padded channels, back to (T, B, C, Ho, Wo)
    out = out.reshape(T, B, Ho, Wo1, Npad)[:, :, :, :Wo, :C]
    return jnp.transpose(out, (0, 1, 4, 2, 3))


# ------------------------------ pure-JAX reference ----------------------------
def reference(x, conv_w, conv_b, gamma, beta):
    T, B, C, H, W = x.shape
    v = jnp.zeros((B, C, H, W), jnp.float32)
    spikes = []
    for t in range(T):
        v = v + x[t]
        s = (v >= V_TH).astype(jnp.float32)
        v = v * (1.0 - s)
        spikes.append(s)
    s = jnp.stack(spikes).reshape(T * B, C, H, W)
    y = jax.lax.conv_general_dilated(
        s, conv_w, window_strides=(2, 2), padding=((1, 1), (1, 1)),
        dimension_numbers=('NCHW', 'OIHW', 'NCHW'),
        precision=jax.lax.Precision.HIGHEST) + conv_b[None, :, None, None]
    mean = jnp.mean(y, axis=(0, 2, 3), keepdims=True)
    var = jnp.mean((y - mean) ** 2, axis=(0, 2, 3), keepdims=True)
    yn = (y - mean) / jnp.sqrt(var + BN_EPS)
    yn = yn * gamma[None, :, None, None] + beta[None, :, None, None]
    _, C2, Ho, Wo = y.shape
    return yn.reshape(T, B, C2, Ho, Wo)


if __name__ == "__main__":
    T, B, C, H, W = 4, 2, 4, 16, 16
    key = jax.random.PRNGKey(0)
    k1, k2, k3 = jax.random.split(key, 3)

    x = jax.random.normal(k1, (T, B, C, H, W), jnp.float32)
    temb = jax.random.normal(k2, (T * B, 32), jnp.float32)   # unused by forward

    # Deterministic parameter init matching the module __init__:
    # conv: xavier_uniform weight, zero bias; bn: gamma=1, beta=0.
    fan_in = fan_out = C * 3 * 3
    bound = float(np.sqrt(6.0 / (fan_in + fan_out)))
    conv_w = jax.random.uniform(k3, (C, C, 3, 3), jnp.float32, -bound, bound)
    conv_b = jnp.zeros((C,), jnp.float32)
    bn_gamma = jnp.ones((C,), jnp.float32)
    bn_beta = jnp.zeros((C,), jnp.float32)

    out = jax.block_until_ready(
        spk_downsample(x, temb, conv_w, conv_b, bn_gamma, bn_beta))

    assert out.shape == (T, B, C, H // 2, W // 2), out.shape
    ref = reference(x, conv_w, conv_b, bn_gamma, bn_beta)
    # bf16 weights/activations on the MXU path (per perf review) -> slightly looser
    # tolerance than exact-f32 parity; spikes themselves are exact 0/1 in bf16 and
    # all accumulation is f32.
    np.testing.assert_allclose(np.asarray(out), np.asarray(ref), atol=5e-2, rtol=5e-2)
    print("KERNEL_OK")
</pallas_src>

<mosaic_0001>
module attributes {stable_mosaic.version = 11 : i64} {
  func.func @if_neuron_kernel(%arg0: i32, %arg1: i32, %arg2: memref<1x8x128xf32, #tpu.memory_space<vmem>>, %arg3: memref<1x8x128xbf16, #tpu.memory_space<vmem>>, %arg4: memref<8x128xf32, #tpu.memory_space<vmem>>) attributes {dimension_semantics = [#tpu.dimension_semantics<parallel>, #tpu.dimension_semantics<arbitrary>], iteration_bounds = array<i64: 2, 4>, scalar_prefetch = 0 : i64, scratch_operands = 1 : i64, tpu.core_type = #tpu.core_type<tc>, window_params = [{transform_indices = @transform_0, window_bounds = array<i64: 1, 8, 128>}, {transform_indices = @transform_1, window_bounds = array<i64: 1, 8, 128>}]} {
    %c0_i32 = arith.constant 0 : i32
    %0 = arith.cmpi eq, %arg1, %c0_i32 : i32
    %1 = arith.extui %0 : i1 to i32
    %c0_i32_0 = arith.constant 0 : i32
    %2 = arith.cmpi ne, %1, %c0_i32_0 : i32
    scf.if %2 {
      %cst_11 = arith.constant 0.000000e+00 : f32
      %19 = vector.broadcast %cst_11 : f32 to vector<8x128xf32>
      %c0_12 = arith.constant 0 : index
      %c0_13 = arith.constant 0 : index
      %20 = vector.load %arg4[%c0_12, %c0_13] : memref<8x128xf32, #tpu.memory_space<vmem>>, vector<8x128xf32>
      tpu.vector_store %arg4[%c0_12, %c0_13], %19 {strides = array<i32>} : memref<8x128xf32, #tpu.memory_space<vmem>>, vector<8x128xf32>,
    } else {
    }
    %c0 = arith.constant 0 : index
    %c0_1 = arith.constant 0 : index
    %3 = vector.load %arg4[%c0, %c0_1] : memref<8x128xf32, #tpu.memory_space<vmem>>, vector<8x128xf32>
    %c0_2 = arith.constant 0 : index
    %c0_3 = arith.constant 0 : index
    %c0_4 = arith.constant 0 : index
    %4 = vector.load %arg2[%c0_2, %c0_3, %c0_4] : memref<1x8x128xf32, #tpu.memory_space<vmem>>, vector<1x8x128xf32>
    %5 = vector.shape_cast %4 : vector<1x8x128xf32> to vector<8x128xf32>
    %6 = arith.addf %3, %5 : vector<8x128xf32>
    %cst = arith.constant 1.000000e+00 : f32
    %7 = vector.broadcast %cst : f32 to vector<8x128xf32>
    %8 = arith.cmpf oge, %6, %7 : vector<8x128xf32>
    %9 = arith.extui %8 : vector<8x128xi1> to vector<8x128xi32>
    %10 = arith.sitofp %9 : vector<8x128xi32> to vector<8x128xf32>
    %cst_5 = arith.constant 1.000000e+00 : f32
    %11 = vector.broadcast %cst_5 : f32 to vector<8x128xf32>
    %12 = arith.subf %11, %10 : vector<8x128xf32>
    %13 = arith.mulf %6, %12 : vector<8x128xf32>
    %c0_6 = arith.constant 0 : index
    %c0_7 = arith.constant 0 : index
    %14 = vector.load %arg4[%c0_6, %c0_7] : memref<8x128xf32, #tpu.memory_space<vmem>>, vector<8x128xf32>
    tpu.vector_store %arg4[%c0_6, %c0_7], %13 {strides = array<i32>} : memref<8x128xf32, #tpu.memory_space<vmem>>, vector<8x128xf32>,
    %15 = arith.truncf %10 : vector<8x128xf32> to vector<8x128xbf16>
    %c0_8 = arith.constant 0 : index
    %c0_9 = arith.constant 0 : index
    %c0_10 = arith.constant 0 : index
    %16 = vector.load %arg3[%c0_8, %c0_9, %c0_10] : memref<1x8x128xbf16, #tpu.memory_space<vmem>>, vector<1x8x128xbf16>
    %17 = vector.shape_cast %16 : vector<1x8x128xbf16> to vector<8x128xbf16>
    %18 = vector.shape_cast %15 : vector<8x128xbf16> to vector<1x8x128xbf16>
    tpu.vector_store %arg3[%c0_8, %c0_9, %c0_10], %18 {strides = array<i32>} : memref<1x8x128xbf16, #tpu.memory_space<vmem>>, vector<1x8x128xbf16>,
    return
  }
  func.func @transform_0(%arg0: i32, %arg1: i32) -> (i32, i32, i32) {
    %c0_i32 = arith.constant 0 : i32
    %c0_i32_0 = arith.constant 0 : i32
    return %arg1, %arg0, %c0_i32 : i32, i32, i32
  }
  func.func @transform_1(%arg0: i32, %arg1: i32) -> (i32, i32, i32) {
    %c0_i32 = arith.constant 0 : i32
    %c0_i32_0 = arith.constant 0 : i32
    return %arg1, %arg0, %c0_i32 : i32, i32, i32
  }
}

</mosaic_0001>

<bundles_post_ra>
// kernel: tpu_custom_call.1
= control target key start
LH: loop header
LB: loop body
LE: loop exit
PB: predicated region body
PF: predicated region fallthrough
CT: control target
= control target key end

     0   :  { %6 = vsyncpa [#allocation4], 0  ;;  %s668_s0 = inlined_call_operand.hbm [shape: f32[4,16,128], index: 0, kind: input, shape index: {}]   ;;  %s669_s1 = inlined_call_operand.hbm [shape: bf16[4,16,128], index: 1, kind: output, shape index: {}]  }
   0x1   :  { %8 = vsyncpa [#allocation4 + $0x1], 0 }
   0x2   :  { %9 = vsyncpa [#allocation5], 0 }
   0x3   :  { %11 = vsyncpa [#allocation5 + $0x1], 0  ;;  %s504_s6 = smov 0   ;;  %s506_s7 = smov 0  }
   0x4   :  { %s508_s8 = smov 0   ;;  %s510_s9 = smov 0  }
   0x5   :  { %s512_s10 = smov 0   ;;  %s514_s11 = smov 0  }
   0x6   :  { %s516_s12 = smov 0   ;;  %s518_s13 = smov 0  }
   0x7 LB: > { %s267_s14 = sadd.s32 4294967295, %s488_s13   ;;  %s268_s15 = sadd.s32 4294967294, %s488_s13   ;;  %s488_s13 = sphi %s518_s13, %s17_s13   ;;  %s484_s12 = sphi %s516_s12, %s682_s12   ;;  %s480_s11 = sphi %s514_s11, %s681_s11   ;;  %s476_s10 = sphi %s512_s10, %s680_s10   ;;  %s472_s9 = sphi %s510_s9, %s679_s9   ;;  %s468_s8 = sphi %s508_s8, %s678_s8   ;;  %s464_s7 = sphi %s506_s7, %s677_s7   ;;  %s460_s6 = sphi %s504_s6, %s676_s6  }
   0x8   : > { %s26_s16 = sadd.s32 1, %s480_s11  ;;  %s29_s17 = sadd.s32 1, %s484_s12 }
   0x9   : > { %p27_p0 = scmp.ge.s32.totalorder %s26_s16, 4  ;;  %s38_s18 = sadd.s32 1, %s468_s8 }
   0xa   : > { %p45_p1 = scmp.ne.s32.totalorder %s468_s8, %s464_s7  ;;  %p46_p2 = scmp.eq.s32.totalorder %s488_s13, 0 }
   0xb   : > { %s684_s16 = smov (%p27_p0, %s26_s16), 0  ;;  %s686_s17 = smov (!%p27_p0, %s29_s17), %s484_s12 }
   0xc   : > { %s33_s19 = ssub.s32 %s480_s11, %s684_s16  ;;  %p557_p3 = por %p46_p2, %p45_p1 }
   0xd   : > { %p31_p4 = scmp.ge.s32.totalorder %s686_s17, 2  ;;  %p51_p5 = scmp.ne.s32.totalorder %s464_s7, %s460_s6 }
   0xe   : > { %p52_p6 = scmp.eq.s32.totalorder %s267_s14, 0  ;;  %p77_p7 = scmp.eq.s32.totalorder %s267_s14, 7 }
   0xf   : > { %s688_s17 = smov (%p31_p4, %s686_s17), 0  ;;  %p83_p10 = scmp.eq.s32.totalorder %s268_s15, 7 }
  0x10   : > { %p565_p8 = por %p52_p6, %p51_p5  ;;  %p569_p9 = por %p77_p7, %p45_p1 }
  0x11   : > { %s34_s23 = ssub.s32 %s484_s12, %s688_s17  ;;  %p575_p12 = por %p83_p10, %p51_p5 }
  0x12   : > { %s35_s24 = sor.u32 %s34_s23, %s33_s19  ;;  %p296_p13 = scmp.lt.s32.totalorder %s488_s13, 8 }
  0x13   : > { %p36_p11 = scmp.eq.s32.totalorder %s35_s24, 0  ;;  %s103_s26 = sand.u32 1, %s468_s8  }
  0x14   : > { %s673_s25 = scalar_select %p575_p12, 1, 0 }
  0x15   : > { %s582_s27 = scalar_select %p36_p11, %s468_s8, %s38_s18  }
  0x16   : > { %s271_s28 = sshll.u32 %s103_s26, 3  ;;  %s272_s29 = sshll.u32 %s480_s11, 1 }
  0x17   : > { %s112_s30 = sadd.s32 %s484_s12, %s272_s29  ;;  %s107_s2 = scalar_lea.vmem [#allocation3], %s271_s28 }
  0x18   : > { %s116_s3 = sshll.u32 %s107_s2, 4  ;;  %s273_s4 = sshll.u32 %s112_s30, 7  ;;  %s117_s3 = int_to_ptr.vmem [resolvable:$true] %s116_s3 }
  0x19   : > { %s114_s15 = scalar_lea.hbm %s668_s0, %s273_s4  ;;  %p591_p0 = pnand %p296_p13, %p557_p3 }
  0x1a   : > { %p274_p1 = scmp.ge.s32.totalorder %s488_s13, 1  ;;  %p121_p2 = scmp.lt.s32.totalorder %s488_s13, 9 }
  0x1b   : > { %s104_s18 = scalar_lea.sflag [#allocation4], %s103_s26  ;;  %p366_p4 = pneg %p591_p0 }
  0x1c   : > { %s377_s23 = scalar_lea.vmem %s117_s3, 128  ;;  %s490_s24 = smov [#allocation3]  }
  0x1d   : > { %p378_p5 = scmp.ne.s32.totalorder %s117_s3, %s377_s23  ;;  %s382_s28 = sshll.u32 %s490_s24, 4  ;;  %s383_s28 = int_to_ptr.vmem [resolvable:$false] %s382_s28 }
  0x1e   : > { %s384_s29 = scalar_lea.vmem %s383_s28, 256  ;;  %p385_p10 = scmp.lt.s32.totalorder %s117_s3, %s383_s28 }
  0x1f   : > { %p380_p6 = pnand %p378_p5, %p366_p4  ;;  %p386_p11 = scmp.lt.s32.totalorder %s384_s29, %s377_s23 }
  0x21   : > { %p381_p7 = pneg %p380_p6  ;;  %p387_p3 = por %p386_p11, %p385_p10 }
  0x23   : > { %p388_p13 = pnand %p387_p3, %p381_p7 }
  0x25   : > { %391 = shalt.err (!%p388_p13)
}
  0x26   : > { %291 = dma.hbm_to_vmem [thread:$0]  (!%p591_p0), %s114_s15, 128, %s117_s3, %s104_s18  }
  0x27   : > { %p122_p12 = pnand %p274_p1, %p121_p2 }
  0x28   : > { %s606_s20 = sand.u32 (!%p122_p12), 1, %s464_s7  }
  0x29   : > { %125 = sbr.rel (%p122_p12) target bundleno = 82 (0x52), region = 24  ;;  %s275_s26 = sshll.u32 (!%p122_p12), %s606_s20, 3 }
  0x2a   : > { %s128_s30 = scalar_lea.sflag (!%p122_p12), [#allocation4], %s606_s20  ;;  %s131_s2 = scalar_lea.vmem (!%p122_p12), [#allocation3], %s275_s26 }
  0x2e   : > { %451 = dma.done.wait (%p565_p8), %s128_s30, 128  }
  0x2f   : > { %453 = vsyncadd (%p565_p8), %s128_s30, 4294967168  ;;  %s276_s3 = sshll.u32 %s606_s20, 2  ;;  %p277_p0 = scmp.ne.s32.totalorder %s472_s9, 0 }
  0x30   : > { %s149_s4 = scalar_lea.vmem [#allocation6], %s276_s3 }
  0x31   : > { %153 = sbr.rel (%p277_p0) target bundleno = 56 (0x38), region = 32 }
  0x36   : > { %v491_v0 = vmov 0.0  }
  0x37   : > { %154 = vst [vmem:[#allocation2] sm:$0xff] %v491_v0 }
  0x38 PF: > { %v156_v2 = vld [vmem:[%s131_s2] sm:$0xff]  ;;  %s280_s5 = sshll.u32 %s472_s9, 1  ;;  %s182_s15 = sshll.u32 %s149_s4, 4  ;;  %v492_v4 = vmov 0.0   ;;  %s183_s15 = int_to_ptr.vmem [resolvable:$true] %s182_s15 }
  0x39   : > { %s178_s14 = sadd.s32 %s476_s10, %s280_s5  ;;  %s167_s24 = scalar_lea.sflag [#allocation5], %s606_s20 }
  0x3a   : > { %s281_s21 = sshll.u32 %s178_s14, 6  ;;  %s392_s9 = scalar_lea.vmem %s183_s15, 64 }
  0x3b   : > { %s621_s23 = scalar_lea.hbm %s669_s1, %s281_s21  ;;  %p393_p8 = scmp.ne.s32.totalorder %s183_s15, %s392_s9 }
  0x3c   : > { %s493_s10 = smov [#allocation6]  }
  0x3d   : > { %p394_p12 = pnand %p393_p8, %p569_p9  ;;  %s396_s28 = sshll.u32 %s493_s10, 4  ;;  %s397_s28 = int_to_ptr.vmem [resolvable:$false] %s396_s28 }
  0x3e   : > { %v155_v1 = vld [vmem:[#allocation2] sm:$0xff]  ;;  %s398_s29 = scalar_lea.vmem %s397_s28, 128  ;;  %p399_p2 = scmp.lt.s32.totalorder %s183_s15, %s397_s28 }
  0x3f   : > { %v157_v3 = vadd.f32 %v156_v2, %v155_v1  ;;  %p395_p1 = pneg %p394_p12  ;;  %p400_p4 = scmp.lt.s32.totalorder %s398_s29, %s392_s9 }
  0x41   : > { %vm158_vm0 = vcmp.ge.f32.partialorder %v157_v3, 1.0  ;;  %p401_p5 = por %p400_p4, %p399_p2 }
  0x42   : > { %v278_v5 = vsel %vm158_vm0, 1.0, %v492_v4 }
  0x43   : > { %v161_v6 = vsub.f32 1.0, %v278_v5  ;;  %v164_v7 = vpack.c.bf16 %v278_v5, %v278_v5  ;;  %p402_p6 = pnand %p401_p5, %p395_p1 }
  0x45   : > { %165 = vst [vmem:[%s149_s4] sm:$0xf] %v164_v7  ;;  %v162_v8 = vmul.f32 %v161_v6, %v157_v3 }
  0x46   : > { %405 = shalt.err (!%p402_p6)
}
  0x47   : > { %s406_s26 = scalar_lea.hbm %s621_s23, 64  ;;  %s410_s2 = scalar_lea.hbm %s669_s1, 512 }
  0x48   : > { %p407_p7 = scmp.ne.s32.totalorder %s621_s23, %s406_s26  ;;  %p411_p3 = scmp.lt.s32.totalorder %s621_s23, %s669_s1 }
  0x49   : > { %p412_p13 = scmp.lt.s32.totalorder %s410_s2, %s406_s26 }
  0x4a   : > { %p408_p10 = pnand %p407_p7, %p569_p9 }
  0x4b   : > { %p413_p0 = por %p412_p13, %p411_p3 }
  0x4c   : > { %p409_p11 = pneg %p408_p10 }
  0x4e   : > { %p414_p8 = pnand %p413_p0, %p409_p11 }
  0x50   : > { %417 = shalt.err (!%p414_p8)
}
  0x51   : > { %286 = dma.vmem_to_hbm [thread:$0]  (%p569_p9), %s183_s15, 64, %s621_s23, %s167_s24   ;;  %163 = vst [vmem:[#allocation2] sm:$0xff] %v162_v8 }
  0x52 PF: > { %p297_p12 = scmp.ge.s32.totalorder %s488_s13, 2  ;;  %s194_s5 = sand.u32 1, %s460_s6  }
  0x53   : > { %p675_p1 = scmp.ne.s32.totalorder %s673_s25, 0  ;;  %s195_s14 = scalar_lea.sflag [#allocation5], %s194_s5 }
  0x55   : > { %p293_p2 = pnand %p297_p12, %p675_p1 }
  0x57   : > { %p294_p4 = pneg %p293_p2 }
  0x59   : > { %455 = dma.done.wait (%p294_p4), %s195_s14, 64  }
  0x5a   : > { %457 = vsyncadd (%p294_p4), %s195_s14, 4294967232  ;;  %s17_s13 = sadd.s32 1, %s488_s13   ;;  %s676_s6 = smov %s464_s7 }
  0x5b   : > { %p14_p5 = scmp.ge.s32.totalorder %s17_s13, 10   ;;  %s677_s7 = smov %s468_s8 }
  0x5c   : > { %s678_s8 = smov %s582_s27  ;;  %s679_s9 = smov %s480_s11 }
  0x5d   : > { %s680_s10 = smov %s484_s12  ;;  %s681_s11 = smov %s684_s16 }
  0x5e   : > { %s682_s12 = smov %s688_s17  ;;  %16 = sbr.rel (!%p14_p5) target bundleno = 7 (0x7), region = 73 }
  0x63   :  { %200 = vsyncpa [#allocation4], 1 }
  0x64   :  { %202 = vsyncpa [#allocation4 + $0x1], 1 }
  0x65   :  { %203 = vsyncpa [#allocation5], 1 }
  0x66   :  { %205 = vsyncpa [#allocation5 + $0x1], 1 }

</bundles_post_ra>
